<compile_context>
chip_gen: v6e
topology: v6e:2x2x1
jax: 0.10.0
libtpu: 0.0.40
codegen_flags: <defaults>
</compile_context>

<pallas_src>
import functools

import jax
import jax.numpy as jnp
from jax.experimental import pallas as pl
from jax.experimental.pallas import tpu as pltpu


def _round_up(x, m):
    return ((x + m - 1) // m) * m


def _pick_tm(m, dtype):
    # Bigger row tiles amortize per-step overhead; bf16 packs two rows per sublane.
    target = 1024 if dtype == jnp.bfloat16 else 512
    return min(target, _round_up(m, 8))


def _patch_embed_kernel(x_ref, w_ref, b_ref, o_ref):
    # (tm, K) @ (K, E) on the MXU, f32 accumulation, bias broadcast over rows.
    acc = jnp.dot(x_ref[...], w_ref[...], preferred_element_type=jnp.float32)
    acc = acc + b_ref[...].astype(jnp.float32)
    o_ref[...] = acc.astype(o_ref.dtype)


@functools.partial(jax.jit, static_argnames=("patch_size", "tm", "single_buffer_consts"))
def _patch_embed_impl(x, w, b, *, patch_size, tm, single_buffer_consts):
    """x: (B, C, H, W); w: (E, C, p, p) (PyTorch conv layout); b: (E,)."""
    B, C, Himg, Wimg = x.shape
    p = patch_size
    E = w.shape[0]
    gh, gw = Himg // p, Wimg // p
    n_patches = gh * gw
    M = B * n_patches
    K = C * p * p

    # --- im2col: pure layout plumbing (reshape/transpose), no compute ------------------
    # (B, C, gh, p, gw, p) -> (B, gh, gw, C, p, p) -> (M, K); feature order (c, kh, kw)
    # matches w.reshape(E, C*p*p); row order (b, gh, gw) matches flatten(2).transpose(1,2).
    patches = x.reshape(B, C, gh, p, gw, p).transpose(0, 2, 4, 1, 3, 5).reshape(M, K)
    w2d = w.reshape(E, K).T          # (K, E)
    b2d = b.reshape(1, E)

    # --- pad to sublane/lane friendly shapes (zeros are exact, sliced off below) -------
    K_p = _round_up(K, 128)
    E_p = _round_up(E, 128)
    M_p = _round_up(M, tm)
    patches_p = jnp.pad(patches, ((0, M_p - M), (0, K_p - K)))
    w_p = jnp.pad(w2d, ((0, K_p - K), (0, E_p - E)))
    b_p = jnp.pad(b2d, ((0, 0), (0, E_p - E)))

    itemsize = jnp.dtype(x.dtype).itemsize
    const_kw = {"pipeline_mode": pl.Buffered(1)} if single_buffer_consts else {}

    # VMEM budget: (possibly double-buffered) weights + double-buffered x/out tiles.
    weight_bufs = 1 if single_buffer_consts else 2
    vmem_bytes = int(
        1.25 * (weight_bufs * (K_p * E_p + E_p) * itemsize
                + 2 * tm * (K_p + E_p) * itemsize)
    ) + (2 << 20)
    vmem_bytes = max(16 << 20, min(vmem_bytes, 64 << 20))  # v7x-safe cap

    cost = pl.CostEstimate(
        flops=2 * M_p * K_p * E_p,
        transcendentals=0,
        bytes_accessed=(M_p * K_p + K_p * E_p + E_p + M_p * E_p) * itemsize,
    )

    out_p = pl.pallas_call(
        _patch_embed_kernel,
        out_shape=jax.ShapeDtypeStruct((M_p, E_p), x.dtype),
        grid_spec=pltpu.PrefetchScalarGridSpec(
            num_scalar_prefetch=0,
            grid=(M_p // tm,),
            in_specs=[
                pl.BlockSpec((tm, K_p), lambda i: (i, 0)),                 # patch rows
                pl.BlockSpec((K_p, E_p), lambda i: (0, 0), **const_kw),    # weight (resident)
                pl.BlockSpec((1, E_p), lambda i: (0, 0), **const_kw),      # bias   (resident)
            ],
            out_specs=pl.BlockSpec((tm, E_p), lambda i: (i, 0)),
        ),
        compiler_params=pltpu.CompilerParams(
            dimension_semantics=("parallel",),
            vmem_limit_bytes=vmem_bytes,
        ),
        cost_estimate=cost,
    )(patches_p, w_p, b_p)

    return out_p[:M, :E].reshape(B, n_patches, E)


def patch_embed_forward(x, w, b, *, patch_size, tm=None):
    """PatchEmbed forward. x: (B, C, H, W) -> (B, n_patches, embed_dim)."""
    if tm is None:
        B, _, Himg, Wimg = x.shape
        M = B * (Himg // patch_size) * (Wimg // patch_size)
        tm = _pick_tm(M, x.dtype)
    # TODO(synk): for very large embed/hidden dims add a K/E reduction axis (accumulator
    # scratch + pl.when init/finalize) instead of keeping the full weight resident.
    try:
        return _patch_embed_impl(x, w, b, patch_size=patch_size, tm=tm,
                                 single_buffer_consts=True)
    except Exception:
        # Fallback if this JAX version rejects pipeline_mode=pl.Buffered(1).
        return _patch_embed_impl(x, w, b, patch_size=patch_size, tm=tm,
                                 single_buffer_consts=False)


def _init_params(key, in_chans, patch_size, embed_dim, dtype=jnp.float32):
    """Conv2d default init: uniform(-1/sqrt(fan_in), 1/sqrt(fan_in)), PyTorch layout."""
    kw, kb = jax.random.split(key)
    fan_in = in_chans * patch_size * patch_size
    lim = 1.0 / (fan_in ** 0.5)
    w = jax.random.uniform(kw, (embed_dim, in_chans, patch_size, patch_size), dtype, -lim, lim)
    b = jax.random.uniform(kb, (embed_dim,), dtype, -lim, lim)
    return w, b


if __name__ == "__main__":
    # Small PatchEmbed: batch=2, channels=3, 16x16 image, 8x8 patches, embed_dim=48.
    B, C, IMG, P, E = 2, 3, 16, 8, 48
    n_patches = (IMG // P) ** 2

    key = jax.random.PRNGKey(0)
    kx, kp = jax.random.split(key)
    x = jax.random.normal(kx, (B, C, IMG, IMG), dtype=jnp.float32)
    w, b = _init_params(kp, C, P, E)

    out = patch_embed_forward(x, w, b, patch_size=P)
    jax.block_until_ready(out)

    # Reference: plain-JAX strided conv + flatten(2) + transpose(1, 2).
    ref = jax.lax.conv_general_dilated(
        x, w, window_strides=(P, P), padding="VALID",
        dimension_numbers=("NCHW", "OIHW", "NCHW"),
        precision=jax.lax.Precision.HIGHEST)
    ref = ref + b.reshape(1, E, 1, 1)
    ref = ref.reshape(B, E, n_patches).transpose(0, 2, 1)

    assert out.shape == (B, n_patches, E)
    assert jnp.allclose(out, ref, atol=1e-4, rtol=1e-4), float(jnp.max(jnp.abs(out - ref)))

    print("KERNEL_OK")
</pallas_src>

<mosaic_0001>
module attributes {stable_mosaic.version = 11 : i64} {
  func.func @_patch_embed_kernel(%arg0: i32, %arg1: memref<8x256xf32, #tpu.memory_space<vmem>>, %arg2: memref<256x128xf32, #tpu.memory_space<vmem>>, %arg3: memref<1x128xf32, #tpu.memory_space<vmem>>, %arg4: memref<8x128xf32, #tpu.memory_space<vmem>>) attributes {dimension_semantics = [#tpu.dimension_semantics<parallel>], iteration_bounds = array<i64: 1>, scalar_prefetch = 0 : i64, scratch_operands = 0 : i64, tpu.core_type = #tpu.core_type<tc>, window_params = [{transform_indices = @transform_0, window_bounds = array<i64: 8, 256>}, {pipeline_mode = #tpu.pipeline_mode<synchronous>, transform_indices = @transform_1, window_bounds = array<i64: 256, 128>}, {pipeline_mode = #tpu.pipeline_mode<synchronous>, transform_indices = @transform_2, window_bounds = array<i64: 1, 128>}, {transform_indices = @transform_3, window_bounds = array<i64: 8, 128>}]} {
    %c0 = arith.constant 0 : index
    %c0_0 = arith.constant 0 : index
    %0 = vector.load %arg1[%c0, %c0_0] : memref<8x256xf32, #tpu.memory_space<vmem>>, vector<8x256xf32>
    %c0_1 = arith.constant 0 : index
    %c0_2 = arith.constant 0 : index
    %1 = vector.load %arg2[%c0_1, %c0_2] : memref<256x128xf32, #tpu.memory_space<vmem>>, vector<256x128xf32>
    %cst = arith.constant dense<0.000000e+00> : vector<8x128xf32>
    %2 = tpu.matmul %0, %1, %cst {dimension_numbers = #tpu.dot_dimension_numbers<[1], [0], [0], [1], [0, 0, 1, 1], [], []>} : vector<8x256xf32>, vector<256x128xf32>, vector<8x128xf32> -> vector<8x128xf32>
    %c0_3 = arith.constant 0 : index
    %c0_4 = arith.constant 0 : index
    %3 = vector.load %arg3[%c0_3, %c0_4] : memref<1x128xf32, #tpu.memory_space<vmem>>, vector<1x128xf32>
    %4 = vector.broadcast %3 : vector<1x128xf32> to vector<8x128xf32>
    %5 = arith.addf %2, %4 : vector<8x128xf32>
    %c0_5 = arith.constant 0 : index
    %c0_6 = arith.constant 0 : index
    %6 = vector.load %arg4[%c0_5, %c0_6] : memref<8x128xf32, #tpu.memory_space<vmem>>, vector<8x128xf32>
    tpu.vector_store %arg4[%c0_5, %c0_6], %5 {strides = array<i32>} : memref<8x128xf32, #tpu.memory_space<vmem>>, vector<8x128xf32>,
    return
  }
  func.func @transform_0(%arg0: i32) -> (i32, i32) {
    %c0_i32 = arith.constant 0 : i32
    %c0_i32_0 = arith.constant 0 : i32
    return %arg0, %c0_i32 : i32, i32
  }
  func.func @transform_1(%arg0: i32) -> (i32, i32) {
    %c0_i32 = arith.constant 0 : i32
    %c0_i32_0 = arith.constant 0 : i32
    %c0_i32_1 = arith.constant 0 : i32
    return %c0_i32, %c0_i32_0 : i32, i32
  }
  func.func @transform_2(%arg0: i32) -> (i32, i32) {
    %c0_i32 = arith.constant 0 : i32
    %c0_i32_0 = arith.constant 0 : i32
    %c0_i32_1 = arith.constant 0 : i32
    return %c0_i32, %c0_i32_0 : i32, i32
  }
  func.func @transform_3(%arg0: i32) -> (i32, i32) {
    %c0_i32 = arith.constant 0 : i32
    %c0_i32_0 = arith.constant 0 : i32
    return %arg0, %c0_i32 : i32, i32
  }
}

module attributes {stable_mosaic.version = 11 : i64} {
  func.func @_patch_embed_kernel(%arg0: i32, %arg1: memref<8x256xf32, #tpu.memory_space<vmem>>, %arg2: memref<256x128xf32, #tpu.memory_space<vmem>>, %arg3: memref<1x128xf32, #tpu.memory_space<vmem>>, %arg4: memref<8x128xf32, #tpu.memory_space<vmem>>) attributes {dimension_semantics = [#tpu.dimension_semantics<parallel>], iteration_bounds = array<i64: 1>, scalar_prefetch = 0 : i64, scratch_operands = 0 : i64, tpu.core_type = #tpu.core_type<tc>, window_params = [{transform_indices = @transform_0, window_bounds = array<i64: 8, 256>}, {pipeline_mode = #tpu.pipeline_mode<synchronous>, transform_indices = @transform_1, window_bounds = array<i64: 256, 128>}, {pipeline_mode = #tpu.pipeline_mode<synchronous>, transform_indices = @transform_2, window_bounds = array<i64: 1, 128>}, {transform_indices = @transform_3, window_bounds = array<i64: 8, 128>}]} {
    %c0 = arith.constant 0 : index
    %c0_0 = arith.constant 0 : index
    %0 = vector.load %arg1[%c0, %c0_0] : memref<8x256xf32, #tpu.memory_space<vmem>>, vector<8x256xf32>
    %c0_1 = arith.constant 0 : index
    %c0_2 = arith.constant 0 : index
    %1 = vector.load %arg2[%c0_1, %c0_2] : memref<256x128xf32, #tpu.memory_space<vmem>>, vector<256x128xf32>
    %cst = arith.constant dense<0.000000e+00> : vector<8x128xf32>
    %2 = tpu.matmul %0, %1, %cst {dimension_numbers = #tpu.dot_dimension_numbers<[1], [0], [0], [1], [0, 0, 1, 1], [], []>} : vector<8x256xf32>, vector<256x128xf32>, vector<8x128xf32> -> vector<8x128xf32>
    %c0_3 = arith.constant 0 : index
    %c0_4 = arith.constant 0 : index
    %3 = vector.load %arg3[%c0_3, %c0_4] : memref<1x128xf32, #tpu.memory_space<vmem>>, vector<1x128xf32>
    %4 = vector.broadcast %3 : vector<1x128xf32> to vector<8x128xf32>
    %5 = arith.addf %2, %4 : vector<8x128xf32>
    %c0_5 = arith.constant 0 : index
    %c0_6 = arith.constant 0 : index
    %6 = vector.load %arg4[%c0_5, %c0_6] : memref<8x128xf32, #tpu.memory_space<vmem>>, vector<8x128xf32>
    tpu.vector_store %arg4[%c0_5, %c0_6], %5 {strides = array<i32>} : memref<8x128xf32, #tpu.memory_space<vmem>>, vector<8x128xf32>,
    return
  }
  func.func @transform_0(%arg0: i32) -> (i32, i32) {
    %c0_i32 = arith.constant 0 : i32
    %c0_i32_0 = arith.constant 0 : i32
    return %arg0, %c0_i32 : i32, i32
  }
  func.func @transform_1(%arg0: i32) -> (i32, i32) {
    %c0_i32 = arith.constant 0 : i32
    %c0_i32_0 = arith.constant 0 : i32
    %c0_i32_1 = arith.constant 0 : i32
    return %c0_i32, %c0_i32_0 : i32, i32
  }
  func.func @transform_2(%arg0: i32) -> (i32, i32) {
    %c0_i32 = arith.constant 0 : i32
    %c0_i32_0 = arith.constant 0 : i32
    %c0_i32_1 = arith.constant 0 : i32
    return %c0_i32, %c0_i32_0 : i32, i32
  }
  func.func @transform_3(%arg0: i32) -> (i32, i32) {
    %c0_i32 = arith.constant 0 : i32
    %c0_i32_0 = arith.constant 0 : i32
    return %arg0, %c0_i32 : i32, i32
  }
}

</mosaic_0001>

<bundles_post_ra>
// kernel: _patch_embed_impl.1
= control target key start
LH: loop header
LB: loop body
LE: loop exit
PB: predicated region body
PF: predicated region fallthrough
CT: control target
= control target key end

     0   :  { %s329_s0 = inlined_call_operand.vmem [shape: f32[8,256], index: 0, kind: input, shape index: {}]   ;;  %s330_s1 = inlined_call_operand.vmem [shape: f32[256,128], index: 1, kind: input, shape index: {}]   ;;  %s331_s2 = inlined_call_operand.vmem [shape: f32[1,128], index: 2, kind: input, shape index: {}]   ;;  %s332_s3 = inlined_call_operand.hbm [shape: f32[8,128], index: 3, kind: output, shape index: {}]  }
   0x1   :  { %v48_v0 = vld [vmem:[%s330_s1 + $0xf8] sm:$0xff]  ;;  %v47_v2 = vld [vmem:[%s330_s1 + $0xf0] sm:$0xff]  ;;  %v46_v4 = vld [vmem:[%s330_s1 + $0xe8] sm:$0xff] }
   0x2   :  { %v32_v1 = vld [vmem:[%s330_s1 + $0x78] sm:$0xff]  ;;  %142 = vmatprep.subr.mxu0 %v48_v0  ;;  %v31_v3 = vld [vmem:[%s330_s1 + $0x70] sm:$0xff]  ;;  %v30_v5 = vld [vmem:[%s330_s1 + $0x68] sm:$0xff] }
   0x3   :  { %143 = vmatpush3.msra.mxu0 %v32_v1  ;;  %v45_v6 = vld [vmem:[%s330_s1 + $0xe0] sm:$0xff]  ;;  %v44_v8 = vld [vmem:[%s330_s1 + $0xd8] sm:$0xff]  ;;  %v43_v10 = vld [vmem:[%s330_s1 + $0xd0] sm:$0xff] }
   0x4   :  { %144 = vmatprep.subr.mxu0 %v47_v2  ;;  %v29_v7 = vld [vmem:[%s330_s1 + $0x60] sm:$0xff]  ;;  %v28_v9 = vld [vmem:[%s330_s1 + $0x58] sm:$0xff]  ;;  %v27_v11 = vld [vmem:[%s330_s1 + $0x50] sm:$0xff] }
   0x5   :  { %145 = vmatpush3.msra.mxu0 %v31_v3  ;;  %v42_v12 = vld [vmem:[%s330_s1 + $0xc8] sm:$0xff] }
   0x6   :  { %146 = vmatprep.subr.mxu0 %v46_v4  ;;  %v16_v13 = vld [vmem:[%s329_s0 + $0x8] sm:$0xff] }
   0x7   :  { %147 = vmatpush3.msra.mxu0 %v30_v5  ;;  %v26_v14 = vld [vmem:[%s330_s1 + $0x48] sm:$0xff]  ;;  %120 = vmatprep.mubr.f32.mxu0 %v16_v13 }
   0x8   :  { %148 = vmatprep.subr.mxu0 %v45_v6 }
   0x9   :  { %149 = vmatpush3.msra.mxu0 %v29_v7 }
   0xa   :  { %150 = vmatprep.subr.mxu0 %v44_v8 }
   0xb   :  { %151 = vmatpush3.msra.mxu0 %v28_v9 }
   0xc   :  { %152 = vmatprep.subr.mxu0 %v43_v10 }
   0xd   :  { %8 = vsyncpa [#allocation3], 0  ;;  %153 = vmatpush3.msra.mxu0 %v27_v11  ;;  %v41_v15 = vld [vmem:[%s330_s1 + $0xc0] sm:$0xff]  ;;  %v40_v17 = vld [vmem:[%s330_s1 + $0xb8] sm:$0xff]  ;;  %s200_s28 = smov [#allocation2]  }
   0xe   :  { %154 = vmatprep.subr.mxu0 %v42_v12  ;;  %v25_v16 = vld [vmem:[%s330_s1 + $0x40] sm:$0xff]  ;;  %v24_v18 = vld [vmem:[%s330_s1 + $0x38] sm:$0xff]  ;;  %v39_v19 = vld [vmem:[%s330_s1 + $0xb0] sm:$0xff]  ;;  %s133_s29 = sshll.u32 %s200_s28, 4  ;;  %s134_s29 = int_to_ptr.vmem [resolvable:$true] %s133_s29 }
   0xf   :  { %155 = vmatpush3.msra.mxu0 %v26_v14  ;;  %v23_v20 = vld [vmem:[%s330_s1 + $0x30] sm:$0xff]  ;;  %v38_v21 = vld [vmem:[%s330_s1 + $0xa8] sm:$0xff]  ;;  %v37_v23 = vld [vmem:[%s330_s1 + $0xa0] sm:$0xff]  ;;  %p183_p1 = scmp.lt.s32.totalorder %s134_s29, %s134_s29 }
  0x10   :  { %156 = vmatprep.subr.mxu0 %v41_v15  ;;  %v22_v22 = vld [vmem:[%s330_s1 + $0x28] sm:$0xff]  ;;  %v21_v24 = vld [vmem:[%s330_s1 + $0x20] sm:$0xff]  ;;  %v36_v25 = vld [vmem:[%s330_s1 + $0x98] sm:$0xff] }
  0x11   :  { %157 = vmatpush3.msra.mxu0 %v25_v16  ;;  %v20_v26 = vld [vmem:[%s330_s1 + $0x18] sm:$0xff]  ;;  %v35_v27 = vld [vmem:[%s330_s1 + $0x90] sm:$0xff]  ;;  %v34_v29 = vld [vmem:[%s330_s1 + $0x88] sm:$0xff] }
  0x12   :  { %158 = vmatprep.subr.mxu0 %v40_v17  ;;  %v19_v28 = vld [vmem:[%s330_s1 + $0x10] sm:$0xff]  ;;  %v18_v30 = vld [vmem:[%s330_s1 + $0x8] sm:$0xff]  ;;  %v33_v31 = vld [vmem:[%s330_s1 + $0x80] sm:$0xff] }
  0x13   :  { %159 = vmatpush3.msra.mxu0 %v24_v18  ;;  %v17_v32 = vld [vmem:[%s330_s1] sm:$0xff]  ;;  %s178_s1 = scalar_lea.vmem %s134_s29, 128 }
  0x14   :  { %160 = vmatprep.subr.mxu0 %v39_v19  ;;  %v15_v33 = vld [vmem:[%s329_s0] sm:$0xff]  ;;  %p179_p0 = scmp.ne.s32.totalorder %s134_s29, %s178_s1  ;;  %p184_p2 = scmp.lt.s32.totalorder %s178_s1, %s178_s1 }
  0x15   :  { %161 = vmatpush3.msra.mxu0 %v23_v20  ;;  %v141_v36 = vld [vmem:[%s331_s2] ss:$0 sm:$0xff] }
  0x16   :  { %162 = vmatprep.subr.mxu0 %v38_v21  ;;  %p185_p3 = por %p184_p2, %p183_p1 }
  0x17   :  { %163 = vmatpush3.msra.mxu0 %v22_v22 }
  0x18   :  { %164 = vmatprep.subr.mxu0 %v37_v23  ;;  %p186_p4 = pnand %p185_p3, %p179_p0 }
  0x19   :  { %165 = vmatpush3.msra.mxu0 %v21_v24 }
  0x1a   :  { %166 = vmatprep.subr.mxu0 %v36_v25 }
  0x1b   :  { %167 = vmatpush3.msra.mxu0 %v20_v26 }
  0x1c   :  { %168 = vmatprep.subr.mxu0 %v35_v27 }
  0x1d   :  { %169 = vmatpush3.msra.mxu0 %v19_v28 }
  0x1e   :  { %170 = vmatprep.subr.mxu0 %v34_v29 }
  0x1f   :  { %171 = vmatpush3.msra.mxu0 %v18_v30 }
  0x20   :  { %172 = vmatprep.subr.mxu0 %v33_v31 }
  0x21   :  { %173 = vmatpush3.msra.mxu0 %v17_v32 }
  0x22   :  { %121 = vmatmul.mubr.f32.vlgmr.msra.gmra.mxu0 %v15_v33 }
  0xe2   :  { %v174_v34 = vpop.f32.mrf.mxu0 }
  0xe4   :  { %v175_v35 = vpop.f32.mrf.mxu0 }
  0xe5   :  { %v176_v37 = vadd.f32 %v175_v35, %v174_v34 }
  0xe7   :  { %v123_v38 = vadd.f32 %v176_v37, %v141_v36 }
  0xe9   :  { %126 = vst [vmem:[#allocation2] sm:$0xff] %v123_v38 }
  0xea   :  { %189 = shalt.err (!%p186_p4)
}
  0xeb   :  { %136 = dma.vmem_to_hbm [thread:$0]  %s134_s29, 128, %s332_s3, [#allocation3]  }
  0xec   :  { %198 = dma.done.wait [#allocation3], 128  }
  0xed   :  { %199 = vsyncadd [#allocation3], 4294967168 }
  0xee   :  { %140 = vsyncpa [#allocation3], 1 }

// kernel: _patch_embed_impl.1
= control target key start
LH: loop header
LB: loop body
LE: loop exit
PB: predicated region body
PF: predicated region fallthrough
CT: control target
= control target key end

     0   :  { %s329_s0 = inlined_call_operand.vmem [shape: f32[8,256], index: 0, kind: input, shape index: {}]   ;;  %s330_s1 = inlined_call_operand.vmem [shape: f32[256,128], index: 1, kind: input, shape index: {}]   ;;  %s331_s2 = inlined_call_operand.vmem [shape: f32[1,128], index: 2, kind: input, shape index: {}]   ;;  %s332_s3 = inlined_call_operand.hbm [shape: f32[8,128], index: 3, kind: output, shape index: {}]  }
   0x1   :  { %v48_v0 = vld [vmem:[%s330_s1 + $0xf8] sm:$0xff]  ;;  %v47_v2 = vld [vmem:[%s330_s1 + $0xf0] sm:$0xff]  ;;  %v46_v4 = vld [vmem:[%s330_s1 + $0xe8] sm:$0xff] }
   0x2   :  { %v32_v1 = vld [vmem:[%s330_s1 + $0x78] sm:$0xff]  ;;  %142 = vmatprep.subr.mxu0 %v48_v0  ;;  %v31_v3 = vld [vmem:[%s330_s1 + $0x70] sm:$0xff]  ;;  %v30_v5 = vld [vmem:[%s330_s1 + $0x68] sm:$0xff] }
   0x3   :  { %143 = vmatpush3.msra.mxu0 %v32_v1  ;;  %v45_v6 = vld [vmem:[%s330_s1 + $0xe0] sm:$0xff]  ;;  %v44_v8 = vld [vmem:[%s330_s1 + $0xd8] sm:$0xff]  ;;  %v43_v10 = vld [vmem:[%s330_s1 + $0xd0] sm:$0xff] }
   0x4   :  { %144 = vmatprep.subr.mxu0 %v47_v2  ;;  %v29_v7 = vld [vmem:[%s330_s1 + $0x60] sm:$0xff]  ;;  %v28_v9 = vld [vmem:[%s330_s1 + $0x58] sm:$0xff]  ;;  %v27_v11 = vld [vmem:[%s330_s1 + $0x50] sm:$0xff] }
   0x5   :  { %145 = vmatpush3.msra.mxu0 %v31_v3  ;;  %v42_v12 = vld [vmem:[%s330_s1 + $0xc8] sm:$0xff] }
   0x6   :  { %146 = vmatprep.subr.mxu0 %v46_v4  ;;  %v16_v13 = vld [vmem:[%s329_s0 + $0x8] sm:$0xff] }
   0x7   :  { %147 = vmatpush3.msra.mxu0 %v30_v5  ;;  %v26_v14 = vld [vmem:[%s330_s1 + $0x48] sm:$0xff]  ;;  %120 = vmatprep.mubr.f32.mxu0 %v16_v13 }
   0x8   :  { %148 = vmatprep.subr.mxu0 %v45_v6 }
   0x9   :  { %149 = vmatpush3.msra.mxu0 %v29_v7 }
   0xa   :  { %150 = vmatprep.subr.mxu0 %v44_v8 }
   0xb   :  { %151 = vmatpush3.msra.mxu0 %v28_v9 }
   0xc   :  { %152 = vmatprep.subr.mxu0 %v43_v10 }
   0xd   :  { %8 = vsyncpa [#allocation3], 0  ;;  %153 = vmatpush3.msra.mxu0 %v27_v11  ;;  %v41_v15 = vld [vmem:[%s330_s1 + $0xc0] sm:$0xff]  ;;  %v40_v17 = vld [vmem:[%s330_s1 + $0xb8] sm:$0xff]  ;;  %s200_s28 = smov [#allocation2]  }
   0xe   :  { %154 = vmatprep.subr.mxu0 %v42_v12  ;;  %v25_v16 = vld [vmem:[%s330_s1 + $0x40] sm:$0xff]  ;;  %v24_v18 = vld [vmem:[%s330_s1 + $0x38] sm:$0xff]  ;;  %v39_v19 = vld [vmem:[%s330_s1 + $0xb0] sm:$0xff]  ;;  %s133_s29 = sshll.u32 %s200_s28, 4  ;;  %s134_s29 = int_to_ptr.vmem [resolvable:$true] %s133_s29 }
   0xf   :  { %155 = vmatpush3.msra.mxu0 %v26_v14  ;;  %v23_v20 = vld [vmem:[%s330_s1 + $0x30] sm:$0xff]  ;;  %v38_v21 = vld [vmem:[%s330_s1 + $0xa8] sm:$0xff]  ;;  %v37_v23 = vld [vmem:[%s330_s1 + $0xa0] sm:$0xff]  ;;  %p183_p1 = scmp.lt.s32.totalorder %s134_s29, %s134_s29 }
  0x10   :  { %156 = vmatprep.subr.mxu0 %v41_v15  ;;  %v22_v22 = vld [vmem:[%s330_s1 + $0x28] sm:$0xff]  ;;  %v21_v24 = vld [vmem:[%s330_s1 + $0x20] sm:$0xff]  ;;  %v36_v25 = vld [vmem:[%s330_s1 + $0x98] sm:$0xff] }
  0x11   :  { %157 = vmatpush3.msra.mxu0 %v25_v16  ;;  %v20_v26 = vld [vmem:[%s330_s1 + $0x18] sm:$0xff]  ;;  %v35_v27 = vld [vmem:[%s330_s1 + $0x90] sm:$0xff]  ;;  %v34_v29 = vld [vmem:[%s330_s1 + $0x88] sm:$0xff] }
  0x12   :  { %158 = vmatprep.subr.mxu0 %v40_v17  ;;  %v19_v28 = vld [vmem:[%s330_s1 + $0x10] sm:$0xff]  ;;  %v18_v30 = vld [vmem:[%s330_s1 + $0x8] sm:$0xff]  ;;  %v33_v31 = vld [vmem:[%s330_s1 + $0x80] sm:$0xff] }
  0x13   :  { %159 = vmatpush3.msra.mxu0 %v24_v18  ;;  %v17_v32 = vld [vmem:[%s330_s1] sm:$0xff]  ;;  %s178_s1 = scalar_lea.vmem %s134_s29, 128 }
  0x14   :  { %160 = vmatprep.subr.mxu0 %v39_v19  ;;  %v15_v33 = vld [vmem:[%s329_s0] sm:$0xff]  ;;  %p179_p0 = scmp.ne.s32.totalorder %s134_s29, %s178_s1  ;;  %p184_p2 = scmp.lt.s32.totalorder %s178_s1, %s178_s1 }
  0x15   :  { %161 = vmatpush3.msra.mxu0 %v23_v20  ;;  %v141_v36 = vld [vmem:[%s331_s2] ss:$0 sm:$0xff] }
  0x16   :  { %162 = vmatprep.subr.mxu0 %v38_v21  ;;  %p185_p3 = por %p184_p2, %p183_p1 }
  0x17   :  { %163 = vmatpush3.msra.mxu0 %v22_v22 }
  0x18   :  { %164 = vmatprep.subr.mxu0 %v37_v23  ;;  %p186_p4 = pnand %p185_p3, %p179_p0 }
  0x19   :  { %165 = vmatpush3.msra.mxu0 %v21_v24 }
  0x1a   :  { %166 = vmatprep.subr.mxu0 %v36_v25 }
  0x1b   :  { %167 = vmatpush3.msra.mxu0 %v20_v26 }
  0x1c   :  { %168 = vmatprep.subr.mxu0 %v35_v27 }
  0x1d   :  { %169 = vmatpush3.msra.mxu0 %v19_v28 }
  0x1e   :  { %170 = vmatprep.subr.mxu0 %v34_v29 }
  0x1f   :  { %171 = vmatpush3.msra.mxu0 %v18_v30 }
  0x20   :  { %172 = vmatprep.subr.mxu0 %v33_v31 }
  0x21   :  { %173 = vmatpush3.msra.mxu0 %v17_v32 }
  0x22   :  { %121 = vmatmul.mubr.f32.vlgmr.msra.gmra.mxu0 %v15_v33 }
  0xe2   :  { %v174_v34 = vpop.f32.mrf.mxu0 }
  0xe4   :  { %v175_v35 = vpop.f32.mrf.mxu0 }
  0xe5   :  { %v176_v37 = vadd.f32 %v175_v35, %v174_v34 }
  0xe7   :  { %v123_v38 = vadd.f32 %v176_v37, %v141_v36 }
  0xe9   :  { %126 = vst [vmem:[#allocation2] sm:$0xff] %v123_v38 }
  0xea   :  { %189 = shalt.err (!%p186_p4)
}
  0xeb   :  { %136 = dma.vmem_to_hbm [thread:$0]  %s134_s29, 128, %s332_s3, [#allocation3]  }
  0xec   :  { %198 = dma.done.wait [#allocation3], 128  }
  0xed   :  { %199 = vsyncadd [#allocation3], 4294967168 }
  0xee   :  { %140 = vsyncpa [#allocation3], 1 }

</bundles_post_ra>
